<compile_context>
chip_gen: v5e
topology: v5e:2x2
jax: 0.10.0
libtpu: 0.0.40
codegen_flags: <defaults>
</compile_context>

<pallas_src>
import jax
import jax.numpy as jnp
from jax import lax
from jax.experimental import pallas as pl
from jax.experimental.pallas import tpu as pltpu

EPS = 1e-5

_MAX_TILE_ROWS = 1024
_PER_BUFFER_CAP = 4 * 1024 * 1024      # bytes per pipeline buffer (~85% roofline)


def _fln_kernel(x_ref, g_ref, b_ref, o_ref):
    # x_ref: (tile_rows, H)   g_ref/b_ref: (1, H) f32   o_ref: (tile_rows, H)
    x = x_ref[...].astype(jnp.float32)
    h = x.shape[-1]
    inv_h = jnp.float32(1.0 / h)

    # Single pass over x: sum and sum of squares.
    s = jnp.sum(x, axis=-1, keepdims=True)
    s2 = jnp.sum(x * x, axis=-1, keepdims=True)
    mean = s * inv_h
    # Clamp: E[x^2] - E[x]^2 can go slightly negative from f32 cancellation.
    var = jnp.maximum(s2 * inv_h - mean * mean, 0.0)
    inv = lax.rsqrt(var + EPS)

    # Fused normalize: (rows,1) lane-broadcasts then (1,H) sublane-broadcasts.
    # No full-tile (inv * gamma) outer-product temporary.
    y = (x - mean) * inv
    o_ref[...] = (y * g_ref[...] + b_ref[...]).astype(o_ref.dtype)


def _vmem_capacity_bytes():
    """Physical VMEM capacity; conservative fallback if the query is unavailable."""
    try:
        return int(pltpu.get_tpu_info().vmem_capacity_bytes)
    except Exception:
        return 64 * 1024 * 1024   # safe on every generation (v7x floor)


def _choose_tile_rows(rows, H, dtype, vmem_cap):
    """Largest aligned row tile whose pipeline buffers + f32 temps fit the budget."""
    itemsize = jnp.dtype(dtype).itemsize
    # Sublane alignment: 8 rows for 32-bit, 16 for 16-bit packed dtypes.
    align = 16 if itemsize < 4 else 8

    # Block budget: tighter on small-VMEM parts (v7x: 64 MiB physical).
    if vmem_cap <= 64 * 1024 * 1024:
        block_budget = 16 * 1024 * 1024
    else:
        block_budget = 24 * 1024 * 1024

    # Bytes/row in flight: 2x double-buffered input + 2x double-buffered output
    # blocks, plus ~2 full-tile f32 temporaries inside the kernel body.
    bytes_per_row = 4 * H * itemsize + 2 * H * 4
    max_by_budget = max(1, block_budget // bytes_per_row)
    max_by_buffer = max(1, _PER_BUFFER_CAP // (H * itemsize))

    tile = min(_MAX_TILE_ROWS, max_by_budget, max_by_buffer, rows)

    # Keep >= 2 grid steps so the "parallel" axis can feed both v7x TensorCores.
    if rows >= 2 * align:
        tile = min(tile, align * max(1, rows // (2 * align)))

    tile = max(align, (tile // align) * align)
    return tile


def final_layernorm_pallas(hidden_states, gamma, beta, *, tile_rows=None):
    """hidden_states: [S, B, H]; gamma/beta: [H]."""
    S, B, H = hidden_states.shape
    rows = S * B
    x2d = hidden_states.reshape(rows, H)

    vmem_cap = _vmem_capacity_bytes()
    if tile_rows is None:
        tile_rows = _choose_tile_rows(rows, H, hidden_states.dtype, vmem_cap)

    # Ragged rows: no padding. grid = cdiv(rows, tile); Pallas masks the
    # partial edge block. Per-row statistics never mix rows, so the garbage in
    # the out-of-bounds slice of that block only affects discarded rows.
    num_tiles = pl.cdiv(rows, tile_rows)

    # Scoped VMEM limit: ~75% of physical capacity (generation-aware), which
    # also lifts v5e's small 16 MiB default.
    vmem_limit = min(int(0.75 * vmem_cap), 96 * 1024 * 1024)

    # Pre-cast affine params to f32 once (kept VMEM-resident via constant
    # index_map; no per-tile cast in the kernel).
    g2d = gamma.astype(jnp.float32).reshape(1, H)
    b2d = beta.astype(jnp.float32).reshape(1, H)

    out2d = pl.pallas_call(
        _fln_kernel,
        out_shape=jax.ShapeDtypeStruct((rows, H), hidden_states.dtype),
        grid_spec=pltpu.PrefetchScalarGridSpec(
            num_scalar_prefetch=0,
            grid=(num_tiles,),
            in_specs=[
                pl.BlockSpec((tile_rows, H), lambda i: (i, 0)),
                pl.BlockSpec((1, H), lambda i: (0, 0)),
                pl.BlockSpec((1, H), lambda i: (0, 0)),
            ],
            out_specs=pl.BlockSpec((tile_rows, H), lambda i: (i, 0)),
        ),
        compiler_params=pltpu.CompilerParams(
            dimension_semantics=("parallel",),
            vmem_limit_bytes=vmem_limit,
        ),
    )(x2d, g2d, b2d)

    return out2d.reshape(S, B, H)


def fln_pipe_layer(ipt, gamma, beta):
    """Mirrors FLNPipeLayer.forward: takes the 4-tuple, returns (ln(h), labels)."""
    hidden_states, position_ids, attention_mask, labels = ipt
    hidden_states = final_layernorm_pallas(hidden_states, gamma, beta)
    return (hidden_states, labels)


def _reference(hidden_states, gamma, beta):
    x = hidden_states.astype(jnp.float32)
    mean = jnp.mean(x, axis=-1, keepdims=True)
    var = jnp.mean((x - mean) ** 2, axis=-1, keepdims=True)
    y = (x - mean) * lax.rsqrt(var + EPS)
    return (y * gamma + beta).astype(hidden_states.dtype)


if __name__ == "__main__":
    key = jax.random.PRNGKey(0)
    k_h, k_g, k_b, k_l = jax.random.split(key, 4)

    # --- Main pipe-stage test (even shape) ---
    S, B, H = 8, 2, 128  # seq, batch, hidden

    hidden_states = jax.random.normal(k_h, (S, B, H), dtype=jnp.float32)
    gamma = 1.0 + 0.1 * jax.random.normal(k_g, (H,), dtype=jnp.float32)
    beta = 0.1 * jax.random.normal(k_b, (H,), dtype=jnp.float32)

    # Other pipe inputs (passed through / unused by this stage).
    position_ids = jnp.arange(S)[None, :].repeat(B, axis=0)
    attention_mask = jnp.ones((B, 1, S, S), dtype=jnp.bool_)
    labels = jax.random.randint(k_l, (B, S), 0, 100, dtype=jnp.int32)

    out_hidden, out_labels = fln_pipe_layer(
        (hidden_states, position_ids, attention_mask, labels), gamma, beta)
    jax.block_until_ready(out_hidden)
    jax.block_until_ready(out_labels)

    ref = _reference(hidden_states, gamma, beta)
    assert out_hidden.shape == (S, B, H)
    assert jnp.allclose(out_hidden, ref, atol=1e-4, rtol=1e-5)
    assert jnp.array_equal(out_labels, labels)

    # --- Ragged-rows test (rows not a multiple of the tile, bf16, no padding) ---
    S2, B2, H2 = 5, 3, 256
    k_h2, k_g2, k_b2 = jax.random.split(k_h, 3)
    hs2 = jax.random.normal(k_h2, (S2, B2, H2), dtype=jnp.bfloat16)
    g2 = 1.0 + 0.1 * jax.random.normal(k_g2, (H2,), dtype=jnp.float32)
    b2 = 0.1 * jax.random.normal(k_b2, (H2,), dtype=jnp.float32)
    out2 = final_layernorm_pallas(hs2, g2, b2)
    jax.block_until_ready(out2)
    ref2 = _reference(hs2, g2, b2)
    assert out2.shape == (S2, B2, H2)
    assert jnp.allclose(out2.astype(jnp.float32), ref2.astype(jnp.float32),
                        atol=2e-2, rtol=2e-2)

    # --- Shifted-mean test (exercises the variance clamp) ---
    hs3 = 100.0 + 0.01 * jax.random.normal(k_h, (4, 2, 128), dtype=jnp.float32)
    out3 = final_layernorm_pallas(hs3, gamma, beta)
    jax.block_until_ready(out3)
    assert bool(jnp.all(jnp.isfinite(out3)))

    print("KERNEL_OK")
</pallas_src>

<mosaic_0001>
module attributes {stable_mosaic.version = 11 : i64} {
  func.func @_fln_kernel(%arg0: i32, %arg1: memref<8x128xf32, #tpu.memory_space<vmem>>, %arg2: memref<1x128xf32, #tpu.memory_space<vmem>>, %arg3: memref<1x128xf32, #tpu.memory_space<vmem>>, %arg4: memref<8x128xf32, #tpu.memory_space<vmem>>) attributes {dimension_semantics = [#tpu.dimension_semantics<parallel>], iteration_bounds = array<i64: 2>, scalar_prefetch = 0 : i64, scratch_operands = 0 : i64, tpu.core_type = #tpu.core_type<tc>, window_params = [{transform_indices = @transform_0, window_bounds = array<i64: 8, 128>}, {pipeline_mode = #tpu.pipeline_mode<synchronous>, transform_indices = @transform_1, window_bounds = array<i64: 1, 128>}, {pipeline_mode = #tpu.pipeline_mode<synchronous>, transform_indices = @transform_2, window_bounds = array<i64: 1, 128>}, {transform_indices = @transform_3, window_bounds = array<i64: 8, 128>}]} {
    %c0 = arith.constant 0 : index
    %c0_0 = arith.constant 0 : index
    %0 = vector.load %arg1[%c0, %c0_0] : memref<8x128xf32, #tpu.memory_space<vmem>>, vector<8x128xf32>
    %cst = arith.constant dense<0.000000e+00> : vector<8xf32>
    %1 = vector.multi_reduction <add>, %0, %cst [1] : vector<8x128xf32> to vector<8xf32>
    %2 = vector.shape_cast %1 : vector<8xf32> to vector<8x1xf32>
    %3 = arith.mulf %0, %0 : vector<8x128xf32>
    %cst_1 = arith.constant dense<0.000000e+00> : vector<8xf32>
    %4 = vector.multi_reduction <add>, %3, %cst_1 [1] : vector<8x128xf32> to vector<8xf32>
    %5 = vector.shape_cast %4 : vector<8xf32> to vector<8x1xf32>
    %cst_2 = arith.constant 7.812500e-03 : f32
    %6 = vector.broadcast %cst_2 : f32 to vector<8x1xf32>
    %7 = arith.mulf %2, %6 : vector<8x1xf32>
    %cst_3 = arith.constant 7.812500e-03 : f32
    %8 = vector.broadcast %cst_3 : f32 to vector<8x1xf32>
    %9 = arith.mulf %5, %8 : vector<8x1xf32>
    %10 = arith.mulf %7, %7 : vector<8x1xf32>
    %11 = arith.subf %9, %10 : vector<8x1xf32>
    %cst_4 = arith.constant 0.000000e+00 : f32
    %12 = vector.broadcast %cst_4 : f32 to vector<8x1xf32>
    %13 = arith.maximumf %11, %12 : vector<8x1xf32>
    %cst_5 = arith.constant 9.99999974E-6 : f32
    %14 = vector.broadcast %cst_5 : f32 to vector<8x1xf32>
    %15 = arith.addf %13, %14 : vector<8x1xf32>
    %16 = math.rsqrt %15 : vector<8x1xf32>
    %17 = vector.broadcast %7 : vector<8x1xf32> to vector<8x128xf32>
    %18 = arith.subf %0, %17 : vector<8x128xf32>
    %19 = vector.broadcast %16 : vector<8x1xf32> to vector<8x128xf32>
    %20 = arith.mulf %18, %19 : vector<8x128xf32>
    %c0_6 = arith.constant 0 : index
    %c0_7 = arith.constant 0 : index
    %21 = vector.load %arg2[%c0_6, %c0_7] : memref<1x128xf32, #tpu.memory_space<vmem>>, vector<1x128xf32>
    %22 = vector.broadcast %21 : vector<1x128xf32> to vector<8x128xf32>
    %23 = arith.mulf %20, %22 : vector<8x128xf32>
    %c0_8 = arith.constant 0 : index
    %c0_9 = arith.constant 0 : index
    %24 = vector.load %arg3[%c0_8, %c0_9] : memref<1x128xf32, #tpu.memory_space<vmem>>, vector<1x128xf32>
    %25 = vector.broadcast %24 : vector<1x128xf32> to vector<8x128xf32>
    %26 = arith.addf %23, %25 : vector<8x128xf32>
    %c0_10 = arith.constant 0 : index
    %c0_11 = arith.constant 0 : index
    %27 = vector.load %arg4[%c0_10, %c0_11] : memref<8x128xf32, #tpu.memory_space<vmem>>, vector<8x128xf32>
    tpu.vector_store %arg4[%c0_10, %c0_11], %26 {strides = array<i32>} : memref<8x128xf32, #tpu.memory_space<vmem>>, vector<8x128xf32>,
    return
  }
  func.func @transform_0(%arg0: i32) -> (i32, i32) {
    %c0_i32 = arith.constant 0 : i32
    %c0_i32_0 = arith.constant 0 : i32
    return %arg0, %c0_i32 : i32, i32
  }
  func.func @transform_1(%arg0: i32) -> (i32, i32) {
    %c0_i32 = arith.constant 0 : i32
    %c0_i32_0 = arith.constant 0 : i32
    %c0_i32_1 = arith.constant 0 : i32
    return %c0_i32, %c0_i32_0 : i32, i32
  }
  func.func @transform_2(%arg0: i32) -> (i32, i32) {
    %c0_i32 = arith.constant 0 : i32
    %c0_i32_0 = arith.constant 0 : i32
    %c0_i32_1 = arith.constant 0 : i32
    return %c0_i32, %c0_i32_0 : i32, i32
  }
  func.func @transform_3(%arg0: i32) -> (i32, i32) {
    %c0_i32 = arith.constant 0 : i32
    %c0_i32_0 = arith.constant 0 : i32
    return %arg0, %c0_i32 : i32, i32
  }
}

</mosaic_0001>

<bundles_post_ra>
// kernel: tpu_custom_call.1
= control target key start
LH: loop header
LB: loop body
LE: loop exit
PB: predicated region body
PF: predicated region fallthrough
CT: control target
= control target key end

     0   :  { %8 = vsyncpa [#allocation3], 0  ;;  %s707_s0 = inlined_call_operand.hbm [shape: f32[16,128], index: 0, kind: input, shape index: {}]   ;;  %s708_s1 = inlined_call_operand.hbm [shape: f32[1,128], index: 1, kind: input, shape index: {}]   ;;  %s709_s2 = inlined_call_operand.vmem [shape: f32[1,128], index: 2, kind: input, shape index: {}]   ;;  %s710_s3 = inlined_call_operand.hbm [shape: f32[16,128], index: 3, kind: output, shape index: {}]  }
   0x1   :  { %10 = vsyncpa [#allocation3 + $0x1], 0 }
   0x2   :  { %11 = vsyncpa [#allocation6], 0 }
   0x3   :  { %12 = vsyncpa [#allocation4], 0 }
   0x4   :  { %14 = vsyncpa [#allocation4 + $0x1], 0  ;;  %s562_s12 = smov 0   ;;  %s564_s13 = smov 0  }
   0x5   :  { %s566_s14 = smov 0   ;;  %s568_s15 = smov 0  }
   0x6 LB: > { %s583_s16 = sadd.s32 4294967295, %s539_s15   ;;  %s334_s17 = sadd.s32 4294967294, %s539_s15   ;;  %s539_s15 = sphi %s568_s15, %s720_s15   ;;  %s535_s14 = sphi %s566_s14, %s719_s14   ;;  %s531_s13 = sphi %s564_s13, %s718_s13   ;;  %s527_s12 = sphi %s562_s12, %s717_s12  }
   0x7   : > { %p40_p0 = scmp.ne.s32.totalorder %s531_s13, %s527_s12  ;;  %p41_p1 = scmp.eq.s32.totalorder %s583_s16, 0 }
   0x8   : > { %p106_p2 = scmp.eq.s32.totalorder %s583_s16, 1  ;;  %p112_p3 = scmp.eq.s32.totalorder %s334_s17, 1 }
   0x9   : > { %p592_p4 = por %p41_p1, %p40_p0  ;;  %p335_p5 = scmp.ge.s32.totalorder %s539_s15, 1 }
   0xa   : > { %p597_p6 = por %p112_p3, %p40_p0  ;;  %p119_p7 = scmp.lt.s32.totalorder %s539_s15, 3 }
   0xb   : > { %s131_s22 = sshll.u32 %s708_s1, 4  ;;  %s541_s24 = smov [#allocation5]   ;;  %s132_s22 = int_to_ptr.hbm [resolvable:$true] %s131_s22 }
   0xc   : > { %p605_p8 = pnand %p335_p5, %p119_p7  ;;  %s133_s25 = sshll.u32 %s541_s24, 4  ;;  %s134_s25 = int_to_ptr.vmem [resolvable:$true] %s133_s25 }
   0xd   : > { %s615_s26 = sadd.s32 1, %s539_s15   ;;  %s27_s27 = sadd.s32 1, %s535_s14 }
   0xe   : > { %p356_p10 = pneg %p605_p8  ;;  %s24_s28 = ssub.s32 %s539_s15, %s615_s26 }
   0xf   : > { %p25_p12 = scmp.eq.s32.totalorder %s24_s28, 0  ;;  %p34_p13 = scmp.ne.s32.totalorder %s535_s14, %s531_s13 }
  0x10   : > { %p357_p11 = pnand %p356_p10, %p41_p1  ;;  %p35_p0 = scmp.eq.s32.totalorder %s539_s15, 0 }
  0x11   : > { %s624_s29 = scalar_select %p25_p12, %s535_s14, %s27_s27  }
  0x12   : > { %359 = dma.hbm_to_vmem [thread:$0]  (!%p357_p11), %s132_s22, 16, %s134_s25, [#allocation6]  }
  0x13   : > { %p628_p3 = por %p106_p2, %p34_p13  ;;  %p369_p5 = scmp.lt.s32.totalorder %s539_s15, 2 }
  0x14   : > { %s147_s4 = sand.u32 1, %s535_s14   ;;  %s339_s5 = sshll.u32 %s539_s15, 3 }
  0x15   : > { %p36_p7 = por %p35_p0, %p34_p13  ;;  %s338_s6 = sshll.u32 %s147_s4, 3 }
  0x16   : > { %s155_s9 = scalar_lea.hbm %s707_s0, %s339_s5  ;;  %s151_s11 = scalar_lea.vmem [#allocation2], %s338_s6 }
  0x17   : > { %s157_s10 = sshll.u32 %s155_s9, 4  ;;  %s159_s17 = sshll.u32 %s151_s11, 4  ;;  %s158_s10 = int_to_ptr.hbm [resolvable:$true] %s157_s10  ;;  %s160_s17 = int_to_ptr.vmem [resolvable:$true] %s159_s17 }
  0x18   : > { %p638_p10 = pnand %p369_p5, %p36_p7  ;;  %s148_s21 = scalar_lea.sflag [#allocation3], %s147_s4 }
  0x19   : > { %s439_s22 = sshra.s32 %s158_s10, 4  ;;  %s446_s28 = scalar_lea.hbm %s707_s0, 16  ;;  %s440_s22 = int_to_ptr.hbm [resolvable:$true] %s439_s22 }
  0x1a   : > { %s441_s24 = scalar_lea.hbm %s440_s22, 8  ;;  %p443_p11 = pneg %p638_p10 }
  0x1b   : > { %p442_p2 = scmp.ne.s32.totalorder %s440_s22, %s441_s24  ;;  %p447_p0 = scmp.lt.s32.totalorder %s440_s22, %s707_s0 }
  0x1c   : > { %p448_p5 = scmp.lt.s32.totalorder %s446_s28, %s441_s24 }
  0x1d   : > { %p444_p12 = pnand %p443_p11, %p442_p2 }
  0x1e   : > { %p449_p7 = por %p448_p5, %p447_p0 }
  0x1f   : > { %p445_p13 = pneg %p444_p12 }
  0x21   : > { %p450_p9 = pnand %p449_p7, %p445_p13 }
  0x23   : > { %453 = shalt.err (!%p450_p9)
}
  0x24   : > { %363 = dma.hbm_to_vmem [thread:$0]  (!%p638_p10), %s158_s10, 128, %s160_s17, %s148_s21  }
  0x25   : > { %168 = sbr.rel (%p605_p8) target bundleno = 205 (0xcd), region = 32  ;;  %s655_s4 = sand.u32 (!%p605_p8), 1, %s531_s13  }
  0x26   : > { %s341_s7 = sshll.u32 (!%p605_p8), %s655_s4, 3  ;;  %s171_s8 = scalar_lea.sflag (!%p605_p8), [#allocation3], %s655_s4 }
  0x27   : > { %s174_s9 = scalar_lea.vmem (!%p605_p8), [#allocation2], %s341_s7 }
  0x2a   : > { %514 = dma.done.wait (%p592_p4), %s171_s8, 128  }
  0x2b   : > { %516 = vsyncadd (%p592_p4), %s171_s8, 4294967168 }
  0x2c   : > { %518 = dma.done.wait (%p41_p1), [#allocation6], 16  }
  0x2d   : > { %520 = vsyncadd (%p41_p1), [#allocation6], 4294967280  ;;  %v203_v0 = vld [vmem:[%s174_s9] sm:$0xff]  ;;  %s345_s18 = sshll.u32 %s583_s16, 3  ;;  %v405_v17 = vld [vmem:[#allocation5] ss:$0 sm:$0xff] }
  0x2e   : > { %204 = vadd.xlane.f32.xlu0 %v203_v0  ;;  %v206_v1 = vmul.f32 %v203_v0, %v203_v0  ;;  %s249_s11 = scalar_lea.hbm %s710_s3, %s345_s18  ;;  %v406_v20 = vld [vmem:[%s709_s2] ss:$0 sm:$0xff]  ;;  %s202_s21 = scalar_lea.vmem [#allocation7], %s341_s7 }
  0x2f   : > { %s251_s16 = sshll.u32 %s202_s21, 4  ;;  %s253_s22 = sshll.u32 %s249_s11, 4  ;;  %s252_s16 = int_to_ptr.vmem [resolvable:$true] %s251_s16  ;;  %s254_s22 = int_to_ptr.hbm [resolvable:$true] %s253_s22 }
  0x30   : > { %s239_s24 = scalar_lea.sflag [#allocation4], %s655_s4  ;;  %s483_s25 = sshra.s32 %s254_s22, 4  ;;  %s484_s25 = int_to_ptr.hbm [resolvable:$true] %s483_s25 }
  0x31   : > { %s485_s27 = scalar_lea.hbm %s484_s25, 8  ;;  %s489_s6 = scalar_lea.hbm %s710_s3, 16 }
  0x32   : > { %p486_p1 = scmp.ne.s32.totalorder %s484_s25, %s485_s27  ;;  %p490_p9 = scmp.lt.s32.totalorder %s484_s25, %s710_s3 }
  0x33   : > { %p491_p10 = scmp.lt.s32.totalorder %s489_s6, %s485_s27 }
  0x34   : > { %p487_p4 = pnand %p486_p1, %p628_p3 }
  0x35   : > { %p492_p2 = por %p491_p10, %p490_p9 }
  0x36   : > { %207 = vadd.xlane.f32.xlu0 %v206_v1  ;;  %p488_p8 = pneg %p487_p4 }
  0x38   : > { %p493_p11 = pnand %p492_p2, %p488_p8 }
  0xa1   : > { %v205_v2 = vpop.xlane.xlu0 %204 }
  0xa2   : > { %v209_v3 = vmul.f32 0.0078125, %v205_v2 }
  0xa4   : > { %v211_v5 = vmul.f32 %v209_v3, %v209_v3  ;;  %v225_v16 = vsub.f32 %v203_v0, %v209_v3 }
  0xa9   : > { %v208_v4 = vpop.xlane.xlu0 %207 }
  0xaa   : > { %v210_v6 = vmul.f32 0.0078125, %v208_v4 }
  0xac   : > { %v212_v7 = vsub.f32 %v210_v6, %v211_v5 }
  0xae   : > { %v213_v8 = vmax.f32 %v212_v7, 0.0 }
  0xb0   : > { %v214_v9 = vadd.f32 1e-05, %v213_v8 }
  0xb2   : > { %407 = vrsqrt.f32 %v214_v9  ;;  %vm221_vm1 = vweird.f32 %v214_v9 }
  0xb8   : > { %v408_v10 = vpop.eup %407 }
  0xb9   : > { %v216_v11 = vmul.f32 %v408_v10, %v214_v9  ;;  %vm222_vm0 = vweird.f32 %v408_v10 }
  0xba   : > { %vm223_vm2 = vmor %vm221_vm1, %vm222_vm0 }
  0xbb   : > { %v217_v12 = vmul.f32 %v408_v10, %v216_v11 }
  0xbd   : > { %v218_v13 = vmul.f32 0.5, %v217_v12 }
  0xbf   : > { %v219_v14 = vsub.f32 1.5, %v218_v13 }
  0xc1   : > { %v220_v15 = vmul.f32 %v408_v10, %v219_v14 }
  0xc3   : > { %v224_v18 = vsel %vm223_vm2, %v408_v10, %v220_v15 }
  0xc4   : > { %v226_v19 = vmul.f32 %v225_v16, %v224_v18 }
  0xc6   : > { %v231_v21 = vmul.f32 %v405_v17, %v226_v19 }
  0xc8   : > { %v236_v22 = vadd.f32 %v406_v20, %v231_v21 }
  0xca   : > { %237 = vst [vmem:[%s202_s21] sm:$0xff] %v236_v22 }
  0xcb   : > { %496 = shalt.err (!%p493_p11)
}
  0xcc   : > { %354 = dma.vmem_to_hbm [thread:$0]  (%p628_p3), %s252_s16, 128, %s254_s22, %s239_s24  }
  0xcd PF: > { %s265_s4 = sand.u32 1, %s527_s12   ;;  %p716_p12 = scmp.ge.s32.totalorder %s539_s15, 2 }
  0xce   : > { %s266_s9 = scalar_lea.sflag [#allocation4], %s265_s4 }
  0xcf   : > { %p365_p13 = pnand %p716_p12, %p597_p6 }
  0xd1   : > { %p366_p0 = pneg %p365_p13 }
  0xd3   : > { %522 = dma.done.wait (%p366_p0), %s266_s9, 128  }
  0xd4   : > { %524 = vsyncadd (%p366_p0), %s266_s9, 4294967168  ;;  %p17_p5 = scmp.ge.s32.totalorder %s615_s26, 4   ;;  %s717_s12 = smov %s531_s13 }
  0xd5   : > { %s718_s13 = smov %s535_s14  ;;  %s719_s14 = smov %s624_s29 }
  0xd6   : > { %s720_s15 = smov %s615_s26  ;;  %19 = sbr.rel (!%p17_p5) target bundleno = 6 (0x6), region = 81 }
  0xdb   :  { %272 = vsyncpa [#allocation3], 1 }
  0xdc   :  { %274 = vsyncpa [#allocation3 + $0x1], 1 }
  0xdd   :  { %275 = vsyncpa [#allocation6], 1 }
  0xde   :  { %276 = vsyncpa [#allocation4], 1 }
  0xdf   :  { %278 = vsyncpa [#allocation4 + $0x1], 1 }

</bundles_post_ra>
